<compile_context>
chip_gen: v5e
topology: v5e:2x2
jax: 0.10.0
libtpu: 0.0.40
codegen_flags: <defaults>
</compile_context>

<pallas_src>
import functools
import numpy as np
import jax
import jax.numpy as jnp
from jax.experimental import pallas as pl
from jax.experimental.pallas import tpu as pltpu

_MIB = 1024 * 1024


# ----------------------------- operator construction (host-side, cached) -----------------------------

def _axis_mask(n, r):
    """1-D indicator matching the module's templete() along one axis, rolled to DC."""
    m = np.zeros((n,), np.float32)
    c = n // 2
    d = r if n % 2 == 0 else r + 1
    m[c - r:c + d] = 1.0
    return np.roll(m, -c)


def _complex_ops(w, h, r):
    m_w = _axis_mask(w, r).astype(np.complex128)
    m_h = _axis_mask(h, r).astype(np.complex128)
    jw = np.arange(w)
    Fw = np.exp(-2j * np.pi * np.outer(jw, jw) / w)          # DFT matrix, W x W
    jh = np.arange(h)
    Fh = np.exp(-2j * np.pi * np.outer(jh, jh) / h)          # DFT matrix, H x H
    A = (np.conj(Fw) @ np.diag(m_w) @ Fw) / w                # left operator  (W x W)
    B = (Fh @ np.diag(m_h) @ np.conj(Fh)) / h                # right operator (H x H)
    return A, B


@functools.lru_cache(maxsize=None)
def make_flat_operator(w, h, r):
    """Real (W*H, W*H) matrix (bf16) s.t. vec_row(y) = vec_row(x) @ Mflat."""
    A, B = _complex_ops(w, h, r)
    # Y[i,k] = sum_{j,l} A[i,j] X[j,l] B[l,k]  ->  Mflat[j*H+l, i*H+k] = Re(A[i,j] B[l,k])
    Mflat = np.kron(A.T, B).real.astype(np.float32)
    return jnp.asarray(Mflat, dtype=jnp.bfloat16)


@functools.lru_cache(maxsize=None)
def make_sandwich_operators(w, h, r):
    """Operators (bf16) for the large-image path: [A_re; -A_im] stacked, plus B_re, B_im."""
    A, B = _complex_ops(w, h, r)
    a_stk = np.concatenate([A.real, -A.imag], axis=0).astype(np.float32)   # (2W, W)
    return (jnp.asarray(a_stk, dtype=jnp.bfloat16),
            jnp.asarray(B.real.astype(np.float32), dtype=jnp.bfloat16),
            jnp.asarray(B.imag.astype(np.float32), dtype=jnp.bfloat16))


# ----------------------------------- tiling helpers -----------------------------------

def _round_up(x, m):
    return ((x + m - 1) // m) * m


def _vmem_limit_bytes():
    """Generation-aware scoped-VMEM limit: 64 MiB on 128-MiB chips (v5e/v6e), 32 MiB otherwise."""
    phys = None
    try:
        info = pltpu.get_tpu_info()
        for name in ("vmem_capacity_bytes", "vmem_size_bytes", "vmem_bytes"):
            v = getattr(info, name, None)
            if v:
                phys = int(v)
                break
    except Exception:
        phys = None
    if phys is None:
        phys = 64 * _MIB                     # conservative: assume v7x-sized VMEM
    return 64 * _MIB if phys >= 100 * _MIB else 32 * _MIB


def _flat_block_rows(rows, wh, limit):
    """Row tile for the flat path: budgets double-buffered f32 in/out blocks (+bf16 cast +
    f32 MXU result ~ 22 B/elem/row) and the double-buffered bf16 operator (4*wh*wh)."""
    budget = (limit * 3) // 4 - 4 * wh * wh
    cap = max(8, budget // (22 * wh))
    cap = min(cap, 1024 if limit >= 64 * _MIB else 512)
    if rows <= cap:
        return rows                          # single grid step, block == full dims, no pad
    cap8 = max(8, (cap // 8) * 8)
    d = cap8
    while d >= max(8, cap8 // 2):            # prefer a multiple-of-8 divisor: no pad copy
        if rows % d == 0:
            return d
        d -= 8
    return cap8                              # ragged tail -> wrapper pads (rare)


def _sandwich_block_rows(rows, w, h, limit):
    """Row tile for the sandwich path: budgets double-buffered f32 in/out blocks, the
    double-buffered bf16 operators and the per-image in-kernel intermediates (~32*wh B)."""
    wh = w * h
    fixed = 4 * (2 * w * w + 2 * h * h) + 32 * wh
    budget = (limit * 3) // 4 - fixed
    cap = max(1, budget // (16 * wh))
    cap = min(cap, 256, rows)
    d = cap
    while d > 1:                             # largest divisor of rows <= cap -> never pad
        if rows % d == 0:
            return d
        d -= 1
    return 1


# ----------------------------------- Pallas kernels -----------------------------------

def _hfs_flat_kernel(x_ref, m_ref, o_ref):
    # x_ref: (TB, W*H) f32 batch block; m_ref: (W*H, W*H) bf16 combined operator.
    # Single lane-dense bf16 MXU matmul with f32 accumulate.
    o_ref[...] = jnp.dot(x_ref[...].astype(jnp.bfloat16), m_ref[...],
                         preferred_element_type=jnp.float32).astype(o_ref.dtype)


def _hfs_sandwich_kernel(x_ref, astk_ref, bre_ref, bim_ref, o_ref):
    # x_ref: (TB, W, H) f32; astk_ref: (2W, W) bf16 = [A_re; -A_im];
    # bre_ref/bim_ref: (H, H) bf16.  Per-image loop keeps intermediates tiny and all
    # contractions in native MXU form (H stays in the lane dimension; no transposes).
    w = o_ref.shape[1]

    def body(i, carry):
        xi = x_ref[i].astype(jnp.bfloat16)                                   # (W, H)
        t = jnp.dot(astk_ref[...], xi, preferred_element_type=jnp.float32)   # (2W, H) = [A_re x; -A_im x]
        t_re = t[:w, :].astype(jnp.bfloat16)                                 # aligned sublane slice
        t_im = t[w:, :].astype(jnp.bfloat16)
        y = (jnp.dot(t_re, bre_ref[...], preferred_element_type=jnp.float32)
             + jnp.dot(t_im, bim_ref[...], preferred_element_type=jnp.float32))
        o_ref[i] = y.astype(o_ref.dtype)
        return carry

    jax.lax.fori_loop(0, x_ref.shape[0], body, 0)


# ----------------------------------- wrappers -----------------------------------

@jax.jit
def _hfs_flat(xb, m):
    rows, wh = xb.shape
    limit = _vmem_limit_bytes()
    tb = _flat_block_rows(rows, wh, limit)
    rows_pad = _round_up(rows, tb)
    if rows_pad != rows:
        xb = jnp.pad(xb, ((0, rows_pad - rows), (0, 0)))
    cost = pl.CostEstimate(flops=2 * rows_pad * wh * wh, transcendentals=0,
                           bytes_accessed=rows_pad * wh * 8 + wh * wh * 2)
    out = pl.pallas_call(
        _hfs_flat_kernel,
        out_shape=jax.ShapeDtypeStruct((rows_pad, wh), jnp.float32),
        grid_spec=pltpu.PrefetchScalarGridSpec(
            num_scalar_prefetch=0,
            grid=(rows_pad // tb,),
            in_specs=[
                pl.BlockSpec((tb, wh), lambda b: (b, 0)),   # x batch block (lane-dense)
                pl.BlockSpec((wh, wh), lambda b: (0, 0)),   # constant operator (fetched once)
            ],
            out_specs=pl.BlockSpec((tb, wh), lambda b: (b, 0)),
        ),
        compiler_params=pltpu.CompilerParams(
            dimension_semantics=("parallel",),
            vmem_limit_bytes=limit),
        cost_estimate=cost,
    )(xb, m)
    return out if rows_pad == rows else out[:rows]


@jax.jit
def _hfs_sandwich(xb, astk, bre, bim):
    rows, w, h = xb.shape
    limit = _vmem_limit_bytes()
    tb = _sandwich_block_rows(rows, w, h, limit)            # always divides rows -> no pad copy
    cost = pl.CostEstimate(flops=4 * rows * w * h * (w + h), transcendentals=0,
                           bytes_accessed=rows * w * h * 8 + (2 * w * w + 2 * h * h) * 2)
    out = pl.pallas_call(
        _hfs_sandwich_kernel,
        out_shape=jax.ShapeDtypeStruct((rows, w, h), jnp.float32),
        grid_spec=pltpu.PrefetchScalarGridSpec(
            num_scalar_prefetch=0,
            grid=(rows // tb,),
            in_specs=[
                pl.BlockSpec((tb, w, h), lambda b: (b, 0, 0)),
                pl.BlockSpec((2 * w, w), lambda b: (0, 0)),   # [A_re; -A_im]
                pl.BlockSpec((h, h), lambda b: (0, 0)),       # B_re
                pl.BlockSpec((h, h), lambda b: (0, 0)),       # B_im
            ],
            out_specs=pl.BlockSpec((tb, w, h), lambda b: (b, 0, 0)),
        ),
        compiler_params=pltpu.CompilerParams(
            dimension_semantics=("parallel",),
            vmem_limit_bytes=limit),
        cost_estimate=cost,
    )(xb, astk, bre, bim)
    return out


def high_freq_suppress(x, w, h, r):
    """x: (N, C, W, H) float -> (N, C, W, H) float32.  Matches HighFreqSuppress.forward."""
    assert x.shape[-2] == w and x.shape[-1] == h
    n, c = x.shape[0], x.shape[1]
    rows = n * c
    x32 = x.astype(jnp.float32)
    # Flat-vs-sandwich crossover; the flat path does more FLOPs but is a single fused,
    # lane-dense matmul.  (Could be lowered to ~512 on v5e's slower MXU if needed.)
    if w * h <= 1024:
        m = make_flat_operator(w, h, r)                      # cached host-side build (bf16)
        y = _hfs_flat(x32.reshape(rows, w * h), m)
        return y.reshape(n, c, w, h)
    astk, bre, bim = make_sandwich_operators(w, h, r)
    y = _hfs_sandwich(x32.reshape(rows, w, h), astk, bre, bim)
    return y.reshape(n, c, w, h)


# ---------------------------------------- reference + test ----------------------------------------

def _reference(x_np, w, h, r):
    # Exact translation of the PyTorch forward (old rfft/irfft, onesided=False).
    temp = np.zeros((w, h), np.float32)
    cw, ch = w // 2, h // 2
    dw = r if w % 2 == 0 else r + 1
    dh = r if h % 2 == 0 else r + 1
    temp[cw - r:cw + dw, ch - r:ch + dh] = 1.0
    temp = np.roll(temp, -cw, axis=0)
    temp = np.roll(temp, -ch, axis=1)
    x_hat = np.fft.fft2(x_np, axes=(-2, -1)) * temp
    return np.real(np.fft.ifft2(x_hat, axes=(-2, -1))).astype(np.float32)


if __name__ == "__main__":
    R = 4

    # Small image -> flat path (single fused (W*H x W*H) operator matmul).
    N, C, W, H = 2, 4, 16, 16
    x = jax.random.normal(jax.random.PRNGKey(0), (N, C, W, H), dtype=jnp.float32)
    y = jax.block_until_ready(high_freq_suppress(x, W, H, R))
    y_ref = _reference(np.asarray(x), W, H, R)
    # bf16 operands -> tolerance relaxed to 2e-2 (observed error is a few 1e-3).
    if not np.allclose(np.asarray(y), y_ref, atol=2e-2, rtol=2e-2):
        raise SystemExit("flat-path mismatch vs FFT reference")

    # Larger image -> separable sandwich path (per-image A / B operator matmuls).
    W2 = H2 = 40
    x2 = jax.random.normal(jax.random.PRNGKey(0), (2, 2, W2, H2), dtype=jnp.float32)
    y2 = jax.block_until_ready(high_freq_suppress(x2, W2, H2, R))
    y2_ref = _reference(np.asarray(x2), W2, H2, R)
    if not np.allclose(np.asarray(y2), y2_ref, atol=2e-2, rtol=2e-2):
        raise SystemExit("sandwich-path mismatch vs FFT reference")

    print("KERNEL_OK")
</pallas_src>

<mosaic_0001>
module attributes {stable_mosaic.version = 11 : i64} {
  func.func @_hfs_flat_kernel(%arg0: i32, %arg1: memref<8x256xf32, #tpu.memory_space<vmem>>, %arg2: memref<256x256xbf16, #tpu.memory_space<vmem>>, %arg3: memref<8x256xf32, #tpu.memory_space<vmem>>) attributes {dimension_semantics = [#tpu.dimension_semantics<parallel>], iteration_bounds = array<i64: 1>, scalar_prefetch = 0 : i64, scratch_operands = 0 : i64, tpu.core_type = #tpu.core_type<tc>, window_params = [{transform_indices = @transform_0, window_bounds = array<i64: 8, 256>}, {pipeline_mode = #tpu.pipeline_mode<synchronous>, transform_indices = @transform_1, window_bounds = array<i64: 256, 256>}, {transform_indices = @transform_2, window_bounds = array<i64: 8, 256>}]} {
    %c0 = arith.constant 0 : index
    %c0_0 = arith.constant 0 : index
    %0 = vector.load %arg1[%c0, %c0_0] : memref<8x256xf32, #tpu.memory_space<vmem>>, vector<8x256xf32>
    %1 = arith.truncf %0 : vector<8x256xf32> to vector<8x256xbf16>
    %c0_1 = arith.constant 0 : index
    %c0_2 = arith.constant 0 : index
    %2 = vector.load %arg2[%c0_1, %c0_2] : memref<256x256xbf16, #tpu.memory_space<vmem>>, vector<256x256xbf16>
    %cst = arith.constant dense<0.000000e+00> : vector<8x256xf32>
    %3 = tpu.matmul %1, %2, %cst {dimension_numbers = #tpu.dot_dimension_numbers<[1], [0], [0], [1], [0, 0, 1, 1], [], []>} : vector<8x256xbf16>, vector<256x256xbf16>, vector<8x256xf32> -> vector<8x256xf32>
    %c0_3 = arith.constant 0 : index
    %c0_4 = arith.constant 0 : index
    %4 = vector.load %arg3[%c0_3, %c0_4] : memref<8x256xf32, #tpu.memory_space<vmem>>, vector<8x256xf32>
    tpu.vector_store %arg3[%c0_3, %c0_4], %3 {strides = array<i32>} : memref<8x256xf32, #tpu.memory_space<vmem>>, vector<8x256xf32>,
    return
  }
  func.func @transform_0(%arg0: i32) -> (i32, i32) {
    %c0_i32 = arith.constant 0 : i32
    %c0_i32_0 = arith.constant 0 : i32
    return %arg0, %c0_i32 : i32, i32
  }
  func.func @transform_1(%arg0: i32) -> (i32, i32) {
    %c0_i32 = arith.constant 0 : i32
    %c0_i32_0 = arith.constant 0 : i32
    %c0_i32_1 = arith.constant 0 : i32
    return %c0_i32, %c0_i32_0 : i32, i32
  }
  func.func @transform_2(%arg0: i32) -> (i32, i32) {
    %c0_i32 = arith.constant 0 : i32
    %c0_i32_0 = arith.constant 0 : i32
    return %arg0, %c0_i32 : i32, i32
  }
}

</mosaic_0001>

<bundles_post_ra>
// kernel: _hfs_flat.1
= control target key start
LH: loop header
LB: loop body
LE: loop exit
PB: predicated region body
PF: predicated region fallthrough
CT: control target
= control target key end

     0   :  { %7 = vsyncpa [#allocation3], 0  ;;  %s582_s0 = inlined_call_operand.hbm [shape: f32[8,256], index: 0, kind: input, shape index: {}]   ;;  %s583_s1 = inlined_call_operand.hbm [shape: bf16[256,256], index: 1, kind: input, shape index: {}]   ;;  %s584_s2 = inlined_call_operand.hbm [shape: f32[8,256], index: 2, kind: output, shape index: {}]  }
   0x1   :  { %8 = vsyncpa [#allocation6], 0 }
   0x2   :  { %9 = vsyncpa [#allocation4], 0  ;;  %s15_s11 = sshll.u32 %s582_s0, 4  ;;  %s553_s12 = smov [#allocation2]   ;;  %s16_s11 = int_to_ptr.hbm [resolvable:$true] %s15_s11 }
   0x3   :  { %s17_s13 = sshll.u32 %s553_s12, 4  ;;  %s25_s16 = sshll.u32 %s583_s1, 4  ;;  %s18_s13 = int_to_ptr.vmem [resolvable:$true] %s17_s13  ;;  %s26_s16 = int_to_ptr.hbm [resolvable:$true] %s25_s16 }
   0x4   :  { %20 = dma.hbm_to_vmem [thread:$0]  %s16_s11, 256, %s18_s13, [#allocation3]  }
   0x5   :  { %s554_s17 = smov [#allocation5]   ;;  %s555_s19 = smov 128  }
   0x6   :  { %s27_s18 = sshll.u32 %s554_s17, 4  ;;  %s556_s20 = smov 8   ;;  %s28_s18 = int_to_ptr.vmem [resolvable:$true] %s27_s18 }
   0x7   :  { %33 = dma.hbm_to_vmem [thread:$0]  %s26_s16, 4096, %s28_s18, [#allocation6], %s555_s19, %s555_s19, %s556_s20  }
   0x8   :  { %547 = dma.done.wait [#allocation3], 256  }
   0x9   :  { %548 = vsyncadd [#allocation3], 4294967040 }
   0xa   :  { %549 = dma.done.wait [#allocation6], 4096  }
   0xb   :  { %550 = vsyncadd [#allocation6], 4294963200  ;;  %v368_v0 = vld [vmem:[#allocation5 + $0x70] sm:$0xf]  ;;  %v453_v1 = vld [vmem:[#allocation5 + $0x74] sm:$0xf0] }
   0xc   :  { %v432_v2 = vld [vmem:[#allocation5 + $0xf0] sm:$0xf]  ;;  %v369_v3 = vor.u32 %v453_v1, %v368_v0  ;;  %v469_v4 = vld [vmem:[#allocation5 + $0xf4] sm:$0xf0]  ;;  %v452_v5 = vld [vmem:[#allocation5 + $0x74] sm:$0xf] }
   0xd   :  { %v370_v6 = vld [vmem:[#allocation5 + $0x78] sm:$0xf0]  ;;  %v433_v7 = vor.u32 %v469_v4, %v432_v2  ;;  %v468_v9 = vld [vmem:[#allocation5 + $0xf4] sm:$0xf]  ;;  %v360_v11 = vld [vmem:[#allocation5 + $0x60] sm:$0xf] }
   0xe   :  { %v373_v8 = vor.u32 %v452_v5, %v370_v6  ;;  %v434_v10 = vld [vmem:[#allocation5 + $0xf8] sm:$0xf0]  ;;  %238 = vmatpush.bf16.msra.mxu0 %v369_v3  ;;  %v451_v13 = vld [vmem:[#allocation5 + $0x64] sm:$0xf0]  ;;  %v424_v14 = vld [vmem:[#allocation5 + $0xe0] sm:$0xf] }
   0xf   :  { %v437_v12 = vor.u32 %v468_v9, %v434_v10  ;;  %v467_v15 = vld [vmem:[#allocation5 + $0xe4] sm:$0xf0]  ;;  %251 = vmatpush.bf16.msra.mxu1 %v433_v7  ;;  %v361_v16 = vor.u32 %v451_v13, %v360_v11  ;;  %v450_v18 = vld [vmem:[#allocation5 + $0x64] sm:$0xf]  ;;  %v362_v19 = vld [vmem:[#allocation5 + $0x68] sm:$0xf0] }
  0x10   :  { %264 = vmatpush.bf16.msra.mxu2 %v373_v8  ;;  %v425_v17 = vor.u32 %v467_v15, %v424_v14  ;;  %v466_v20 = vld [vmem:[#allocation5 + $0xe4] sm:$0xf]  ;;  %v365_v21 = vor.u32 %v450_v18, %v362_v19  ;;  %v426_v22 = vld [vmem:[#allocation5 + $0xe8] sm:$0xf0]  ;;  %v352_v23 = vld [vmem:[#allocation5 + $0x50] sm:$0xf] }
  0x11   :  { %277 = vmatpush.bf16.msra.mxu3 %v437_v12  ;;  %v449_v24 = vld [vmem:[#allocation5 + $0x54] sm:$0xf0]  ;;  %v429_v25 = vor.u32 %v466_v20, %v426_v22  ;;  %v416_v26 = vld [vmem:[#allocation5 + $0xd0] sm:$0xf]  ;;  %v448_v28 = vld [vmem:[#allocation5 + $0x54] sm:$0xf] }
  0x12   :  { %v465_v27 = vld [vmem:[#allocation5 + $0xd4] sm:$0xf0]  ;;  %239 = vmatpush.bf16.msra.mxu0 %v361_v16  ;;  %v353_v29 = vor.u32 %v449_v24, %v352_v23  ;;  %v354_v30 = vld [vmem:[#allocation5 + $0x58] sm:$0xf0]  ;;  %v464_v31 = vld [vmem:[#allocation5 + $0xd4] sm:$0xf] }
  0x13   :  { %v418_v32 = vld [vmem:[#allocation5 + $0xd8] sm:$0xf0]  ;;  %252 = vmatpush.bf16.msra.mxu1 %v425_v17  ;;  %v417_v33 = vor.u32 %v465_v27, %v416_v26  ;;  %v357_v34 = vor.u32 %v448_v28, %v354_v30  ;;  %v344_v35 = vld [vmem:[#allocation5 + $0x40] sm:$0xf]  ;;  %v447_v36 = vld [vmem:[#allocation5 + $0x44] sm:$0xf0] }
  0x14   :  { %265 = vmatpush.bf16.msra.mxu2 %v365_v21  ;;  %v408_v37 = vld [vmem:[#allocation5 + $0xc0] sm:$0xf]  ;;  %v421_v38 = vor.u32 %v464_v31, %v418_v32  ;;  %v463_v39 = vld [vmem:[#allocation5 + $0xc4] sm:$0xf0]  ;;  %v446_v40 = vld [vmem:[#allocation5 + $0x44] sm:$0xf]  ;;  %v345_v44 = vor.u32 %v447_v36, %v344_v35 }
  0x15   :  { %278 = vmatpush.bf16.msra.mxu3 %v429_v25  ;;  %v346_v41 = vld [vmem:[#allocation5 + $0x48] sm:$0xf0]  ;;  %v462_v42 = vld [vmem:[#allocation5 + $0xc4] sm:$0xf]  ;;  %v409_v45 = vor.u32 %v463_v39, %v408_v37  ;;  %v336_v47 = vld [vmem:[#allocation5 + $0x30] sm:$0xf] }
  0x16   :  { %v410_v43 = vld [vmem:[#allocation5 + $0xc8] sm:$0xf0]  ;;  %240 = vmatpush.bf16.msra.mxu0 %v353_v29  ;;  %v349_v46 = vor.u32 %v446_v40, %v346_v41  ;;  %v445_v48 = vld [vmem:[#allocation5 + $0x34] sm:$0xf0]  ;;  %v400_v49 = vld [vmem:[#allocation5 + $0xb0] sm:$0xf] }
  0x17   :  { %253 = vmatpush.bf16.msra.mxu1 %v417_v33  ;;  %v413_v50 = vor.u32 %v462_v42, %v410_v43  ;;  %v461_v51 = vld [vmem:[#allocation5 + $0xb4] sm:$0xf0]  ;;  %v444_v52 = vld [vmem:[#allocation5 + $0x34] sm:$0xf]  ;;  %v338_v53 = vld [vmem:[#allocation5 + $0x38] sm:$0xf0]  ;;  %v337_v56 = vor.u32 %v445_v48, %v336_v47 }
  0x18   :  { %266 = vmatpush.bf16.msra.mxu2 %v357_v34  ;;  %v460_v54 = vld [vmem:[#allocation5 + $0xb4] sm:$0xf]  ;;  %v402_v55 = vld [vmem:[#allocation5 + $0xb8] sm:$0xf0]  ;;  %v401_v57 = vor.u32 %v461_v51, %v400_v49  ;;  %v341_v58 = vor.u32 %v444_v52, %v338_v53  ;;  %v328_v59 = vld [vmem:[#allocation5 + $0x20] sm:$0xf] }
  0x19   :  { %279 = vmatpush.bf16.msra.mxu3 %v421_v38  ;;  %v443_v60 = vld [vmem:[#allocation5 + $0x24] sm:$0xf0]  ;;  %v392_v61 = vld [vmem:[#allocation5 + $0xa0] sm:$0xf]  ;;  %v405_v62 = vor.u32 %v460_v54, %v402_v55  ;;  %v442_v0 = vld [vmem:[#allocation5 + $0x24] sm:$0xf] }
  0x1a   :  { %241 = vmatpush.bf16.msra.mxu0 %v345_v44  ;;  %v459_v63 = vld [vmem:[#allocation5 + $0xa4] sm:$0xf0]  ;;  %v330_v1 = vld [vmem:[#allocation5 + $0x28] sm:$0xf0]  ;;  %v458_v2 = vld [vmem:[#allocation5 + $0xa4] sm:$0xf]  ;;  %v329_v4 = vor.u32 %v443_v60, %v328_v59 }
  0x1b   :  { %254 = vmatpush.bf16.msra.mxu1 %v409_v45  ;;  %v394_v3 = vld [vmem:[#allocation5 + $0xa8] sm:$0xf0]  ;;  %v393_v5 = vor.u32 %v459_v63, %v392_v61  ;;  %v333_v6 = vor.u32 %v442_v0, %v330_v1  ;;  %v320_v7 = vld [vmem:[#allocation5 + $0x10] sm:$0xf]  ;;  %v441_v8 = vld [vmem:[#allocation5 + $0x14] sm:$0xf0] }
  0x1c   :  { %267 = vmatpush.bf16.msra.mxu2 %v349_v46  ;;  %v384_v9 = vld [vmem:[#allocation5 + $0x90] sm:$0xf]  ;;  %v397_v10 = vor.u32 %v458_v2, %v394_v3  ;;  %v457_v11 = vld [vmem:[#allocation5 + $0x94] sm:$0xf0]  ;;  %v440_v12 = vld [vmem:[#allocation5 + $0x14] sm:$0xf]  ;;  %v321_v16 = vor.u32 %v441_v8, %v320_v7 }
  0x1d   :  { %280 = vmatpush.bf16.msra.mxu3 %v413_v50  ;;  %v322_v13 = vld [vmem:[#allocation5 + $0x18] sm:$0xf0]  ;;  %v456_v14 = vld [vmem:[#allocation5 + $0x94] sm:$0xf]  ;;  %v385_v17 = vor.u32 %v457_v11, %v384_v9  ;;  %v312_v19 = vld [vmem:[#allocation5] sm:$0xf] }
  0x1e   :  { %242 = vmatpush.bf16.msra.mxu0 %v337_v56  ;;  %v386_v15 = vld [vmem:[#allocation5 + $0x98] sm:$0xf0]  ;;  %v325_v18 = vor.u32 %v440_v12, %v322_v13  ;;  %v439_v20 = vld [vmem:[#allocation5 + $0x4] sm:$0xf0]  ;;  %v376_v21 = vld [vmem:[#allocation5 + $0x80] sm:$0xf] }
  0x1f   :  { %255 = vmatpush.bf16.msra.mxu1 %v401_v57  ;;  %v389_v22 = vor.u32 %v456_v14, %v386_v15  ;;  %v455_v23 = vld [vmem:[#allocation5 + $0x84] sm:$0xf0]  ;;  %v438_v24 = vld [vmem:[#allocation5 + $0x4] sm:$0xf]  ;;  %v314_v25 = vld [vmem:[#allocation5 + $0x8] sm:$0xf0]  ;;  %v313_v28 = vor.u32 %v439_v20, %v312_v19 }
  0x20   :  { %268 = vmatpush.bf16.msra.mxu2 %v341_v58  ;;  %v454_v26 = vld [vmem:[#allocation5 + $0x84] sm:$0xf]  ;;  %v378_v27 = vld [vmem:[#allocation5 + $0x88] sm:$0xf0]  ;;  %v42_v29 = vld [vmem:[#allocation2] sm:$0xff]  ;;  %v377_v30 = vor.u32 %v455_v23, %v376_v21  ;;  %v317_v31 = vor.u32 %v438_v24, %v314_v25  ;;  %s557_s0 = smov [#allocation7]  }
  0x21   :  { %281 = vmatpush.bf16.msra.mxu3 %v405_v62  ;;  %v43_v32 = vld [vmem:[#allocation2 + $0x8] sm:$0xff]  ;;  %v381_v33 = vor.u32 %v454_v26, %v378_v27  ;;  %v44_v34 = vpack.c.bf16 %v42_v29, %v42_v29  ;;  %s297_s1 = sshll.u32 %s557_s0, 4  ;;  %s299_s23 = sshll.u32 %s584_s2, 4  ;;  %s298_s1 = int_to_ptr.vmem [resolvable:$true] %s297_s1  ;;  %s300_s23 = int_to_ptr.hbm [resolvable:$true] %s299_s23 }
  0x22   :  { %243 = vmatpush.bf16.msra.mxu0 %v329_v4  ;;  %v45_v35 = vpack.c.bf16 %v43_v32, %v43_v32 }
  0x23   :  { %256 = vmatpush.bf16.msra.mxu1 %v393_v5 }
  0x24   :  { %269 = vmatpush.bf16.msra.mxu2 %v333_v6 }
  0x25   :  { %282 = vmatpush.bf16.msra.mxu3 %v397_v10 }
  0x26   :  { %244 = vmatpush.bf16.msra.mxu0 %v321_v16 }
  0x27   :  { %257 = vmatpush.bf16.msra.mxu1 %v385_v17 }
  0x28   :  { %270 = vmatpush.bf16.msra.mxu2 %v325_v18 }
  0x29   :  { %283 = vmatpush.bf16.msra.mxu3 %v389_v22 }
  0x2a   :  { %245 = vmatpush.bf16.msra.mxu0 %v313_v28 }
  0x2b   :  { %258 = vmatpush.bf16.msra.mxu1 %v377_v30 }
  0x2c   :  { %271 = vmatpush.bf16.msra.mxu2 %v317_v31 }
  0x2d   :  { %284 = vmatpush.bf16.msra.mxu3 %v381_v33  ;;  %246 = vmatmul.bf16.vlgmr.msra.gmra.mxu0 %v44_v34 }
  0x2e   :  { %259 = vmatmul.bf16.vlgmr.msra.gmra.mxu1 %v45_v35 }
  0x2f   :  { %272 = vmatmul.bf16.vlgmr.msra.gmra.mxu2 %v44_v34 }
  0x30   :  { %285 = vmatmul.bf16.vlgmr.msra.gmra.mxu3 %v45_v35 }
  0xaa   :  { %v247_v36 = vpop.f32.mrf.mxu0 }
  0xab   :  { %v260_v37 = vpop.f32.mrf.mxu1 }
  0xac   :  { %v261_v38 = vadd.f32 %v260_v37, %v247_v36 }
  0xae   :  { %290 = vst [vmem:[#allocation7] sm:$0xff] %v261_v38 }
  0xb2   :  { %v273_v39 = vpop.f32.mrf.mxu2  ;;  %v249_v41 = vpop.f32.mrf.mxu0 }
  0xb3   :  { %v286_v40 = vpop.f32.mrf.mxu3  ;;  %v262_v43 = vpop.f32.mrf.mxu1 }
  0xb4   :  { %v287_v42 = vadd.f32 %v286_v40, %v273_v39 }
  0xb6   :  { %291 = vst [vmem:[#allocation7 + $0x8] sm:$0xff] %v287_v42 }
  0xb7   :  { %302 = dma.vmem_to_hbm [thread:$0]  %s298_s1, 256, %s300_s23, [#allocation4]  }
  0xba   :  { %v275_v44 = vpop.f32.mrf.mxu2 }
  0xbb   :  { %v288_v45 = vpop.f32.mrf.mxu3 }
  0xbc   :  { %551 = dma.done.wait [#allocation4], 256  }
  0xbd   :  { %552 = vsyncadd [#allocation4], 4294967040 }
  0xbe   :  { %307 = vsyncpa [#allocation3], 1 }
  0xbf   :  { %308 = vsyncpa [#allocation6], 1 }
  0xc0   :  { %309 = vsyncpa [#allocation4], 1 }

</bundles_post_ra>
